<compile_context>
chip_gen: v7x
topology: tpu7x:2x2x1
jax: 0.10.0
libtpu: 0.0.40
codegen_flags: <defaults>
</compile_context>

<pallas_src>
import functools
import math

import jax
import jax.numpy as jnp
from jax import lax
from jax.experimental import pallas as pl
from jax.experimental.pallas import tpu as pltpu


def _round_up(x: int, m: int) -> int:
    return ((x + m - 1) // m) * m


# --------------------------------------------------------------------------
# 1) Hoisted projections:  Qp = Q @ WQ^T + bq,  Kp = K @ WK^T + bk
# --------------------------------------------------------------------------
def _proj_kernel(q_ref, k_ref, wq_ref, bq_ref, wk_ref, bk_ref, qp_ref, kp_ref):
    qp = jnp.dot(q_ref[...], wq_ref[...],
                 preferred_element_type=jnp.float32) + bq_ref[...]
    kp = jnp.dot(k_ref[...], wk_ref[...],
                 preferred_element_type=jnp.float32) + bk_ref[...]
    qp_ref[...] = qp.astype(qp_ref.dtype)
    kp_ref[...] = kp.astype(kp_ref.dtype)


# --------------------------------------------------------------------------
# 2) Streaming score/softmax kernel.
#    Grid = (num_q_tiles, num_kv_tiles); kv axis is the reduction axis.
#    Carries (m, l, diag) per query lane; writes out = 1 - exp(d - m) / l.
# --------------------------------------------------------------------------
def _score_kernel(*refs, n, tile, scale, use_mask, check_pad):
    if use_mask:
        kp_ref, qp_ref, mask_t_ref, out_ref, m_ref, l_ref, d_ref = refs
    else:
        kp_ref, qp_ref, out_ref, m_ref, l_ref, d_ref = refs

    qi = pl.program_id(0)
    ki = pl.program_id(1)

    @pl.when(ki == 0)
    def _init():
        m_ref[...] = jnp.full(m_ref.shape, -jnp.inf, m_ref.dtype)
        l_ref[...] = jnp.zeros(l_ref.shape, l_ref.dtype)
        d_ref[...] = jnp.full(d_ref.shape, -jnp.inf, d_ref.dtype)

    # S^T block: s[kv, q] = <Kp[kv], Qp[q]> * scale.  Contraction is expressed
    # on the last axis of BOTH operands -> no explicit transpose fed to MXU.
    s = lax.dot_general(kp_ref[...], qp_ref[...],
                        dimension_numbers=(((1,), (1,)), ((), ())),
                        preferred_element_type=jnp.float32)
    s = s * jnp.float32(scale)

    if use_mask:
        # masked_fill(S, mask.bool(), -(1 << 32)) -- exact f32 value.
        s = jnp.where(mask_t_ref[...] != 0, jnp.float32(-(1 << 32)), s)

    if check_pad:
        # Padded KV positions (rows of S^T) must not contribute to the softmax.
        kv_pos = ki * tile + lax.broadcasted_iota(jnp.int32, s.shape, 0)
        s = jnp.where(kv_pos < n, s, -jnp.inf)

    # Online softmax statistics, reduced over the KV (sublane) axis -> (1, T).
    m_prev = m_ref[...]
    m_new = jnp.maximum(m_prev, jnp.max(s, axis=0, keepdims=True))
    alpha = jnp.exp(m_prev - m_new)
    p = jnp.exp(s - m_new)
    l_ref[...] = alpha * l_ref[...] + jnp.sum(p, axis=0, keepdims=True)
    m_ref[...] = m_new

    # The global diagonal lives only in the (qi == ki) block at local [r, r].
    @pl.when(ki == qi)
    def _grab_diag():
        row = lax.broadcasted_iota(jnp.int32, s.shape, 0)
        col = lax.broadcasted_iota(jnp.int32, s.shape, 1)
        d_ref[...] = jnp.sum(jnp.where(row == col, s, jnp.float32(0.0)),
                             axis=0, keepdims=True)

    @pl.when(ki == pl.num_programs(1) - 1)
    def _finalize():
        # softmax row sums to 1  =>  out[i] = 1 - softmax(S)[i, i]
        p_diag = jnp.exp(d_ref[...] - m_ref[...])
        inv_l = pl.reciprocal(l_ref[...], approx=False)
        out_ref[...] = (jnp.float32(1.0) - p_diag * inv_l).astype(out_ref.dtype)


# --------------------------------------------------------------------------
# Wrapper
# --------------------------------------------------------------------------
def attention_agger(params, Q, K, V, mask=None, *, block=256,
                    score_dtype=jnp.float32):
    """Pallas implementation of AttentionAgger.forward.  V is unused (as in torch)."""
    del V  # the reference forward never uses V
    wq_t, bq, wk_t, bk = params["wq_t"], params["bq"], params["wk_t"], params["bk"]
    n, qdim = Q.shape
    mdim = wq_t.shape[1]
    assert block % 128 == 0, "block must be a multiple of 128 lanes"
    if mask is not None:
        assert mask.shape == (n, n)

    tile = min(block, _round_up(n, 128))
    n_pad = _round_up(n, tile)
    n_tiles = n_pad // tile
    check_pad = n_pad != n
    use_mask = mask is not None

    q = jnp.pad(Q.astype(jnp.float32), ((0, n_pad - n), (0, 0)))
    k = jnp.pad(K.astype(jnp.float32), ((0, n_pad - n), (0, 0)))

    # ---- projections (done once, not per query tile) -----------------------
    proj_spec = pl.BlockSpec((tile, mdim), lambda r: (r, 0))
    qp, kp = pl.pallas_call(
        _proj_kernel,
        out_shape=(jax.ShapeDtypeStruct((n_pad, mdim), score_dtype),
                   jax.ShapeDtypeStruct((n_pad, mdim), score_dtype)),
        grid_spec=pltpu.PrefetchScalarGridSpec(
            num_scalar_prefetch=0,
            grid=(n_tiles,),
            in_specs=[pl.BlockSpec((tile, qdim), lambda r: (r, 0)),
                      pl.BlockSpec((tile, qdim), lambda r: (r, 0)),
                      pl.BlockSpec((qdim, mdim), lambda r: (0, 0)),
                      pl.BlockSpec((1, mdim), lambda r: (0, 0)),
                      pl.BlockSpec((qdim, mdim), lambda r: (0, 0)),
                      pl.BlockSpec((1, mdim), lambda r: (0, 0))],
            out_specs=(proj_spec, proj_spec)),
        compiler_params=pltpu.CompilerParams(
            dimension_semantics=("parallel",)),
    )(q, k, wq_t.astype(jnp.float32), bq.astype(jnp.float32),
      wk_t.astype(jnp.float32), bk.astype(jnp.float32))

    # ---- streaming score / softmax-diag kernel ------------------------------
    kernel = functools.partial(_score_kernel, n=n, tile=tile,
                               scale=1.0 / math.sqrt(mdim),
                               use_mask=use_mask, check_pad=check_pad)

    in_specs = [pl.BlockSpec((tile, mdim), lambda qi, ki: (ki, 0)),   # Kp tile
                pl.BlockSpec((tile, mdim), lambda qi, ki: (qi, 0))]   # Qp tile
    args = [kp, qp]
    if use_mask:
        # int8, transposed so the streamed tile aligns with S^T[kv, q].
        mask_t = jnp.pad((mask != 0).astype(jnp.int8).T,
                         ((0, n_pad - n), (0, n_pad - n)))
        in_specs.append(pl.BlockSpec((tile, tile), lambda qi, ki: (ki, qi)))
        args.append(mask_t)

    # Explicit VMEM budget: double-buffered input tiles + resident out/scratch.
    item = jnp.dtype(score_dtype).itemsize
    need = (2 * (2 * tile * mdim * item)                 # Qp + Kp tiles, 2-deep
            + (2 * tile * tile if use_mask else 0)       # int8 mask tiles
            + 2 * tile * 4                               # output slab
            + 3 * max(tile, 128) * 4)                    # m / l / d scratch
    vmem_limit = int(min(max(4 * need, 16 << 20), 48 << 20))

    out = pl.pallas_call(
        kernel,
        out_shape=jax.ShapeDtypeStruct((1, n_pad), jnp.float32),
        grid_spec=pltpu.PrefetchScalarGridSpec(
            num_scalar_prefetch=0,
            grid=(n_tiles, n_tiles),
            in_specs=in_specs,
            out_specs=pl.BlockSpec((1, tile), lambda qi, ki: (0, qi)),
            scratch_shapes=[pltpu.VMEM((1, tile), jnp.float32),
                            pltpu.VMEM((1, tile), jnp.float32),
                            pltpu.VMEM((1, tile), jnp.float32)]),
        compiler_params=pltpu.CompilerParams(
            dimension_semantics=("parallel", "arbitrary"),
            vmem_limit_bytes=vmem_limit),
    )(*args)

    # NOTE: for many tiny graphs, batch them with a leading grid axis instead
    # of one call per graph (launch overhead dominates at N~16).
    return out[0, :n]


# --------------------------------------------------------------------------
# Pure-JAX reference mirroring the PyTorch forward exactly.
# --------------------------------------------------------------------------
def attention_agger_ref(params, Q, K, V, mask=None):
    del V
    wq_t, bq, wk_t, bk = params["wq_t"], params["bq"], params["wk_t"], params["bk"]
    mdim = wq_t.shape[1]
    qp = Q @ wq_t + bq
    kp = K @ wk_t + bk
    s = (qp @ kp.T) / math.sqrt(mdim)
    if mask is not None:
        s = jnp.where(mask != 0, jnp.float32(-(1 << 32)), s)
    a = jax.nn.softmax(s, axis=-1)
    a = a * (1.0 - jnp.eye(a.shape[0], dtype=a.dtype))
    return jnp.sum(a, axis=1)


def init_params(key, qdim, mdim):
    """Deterministic synthetic parameters (shapes match nn.Linear(Qdim, Mdim))."""
    k1, k2, k3, k4 = jax.random.split(key, 4)
    bound = 1.0 / math.sqrt(qdim)
    # PyTorch Linear weight is [Mdim, Qdim]; we store its transpose [Qdim, Mdim].
    wq = jax.random.uniform(k1, (mdim, qdim), jnp.float32, -bound, bound)
    wk = jax.random.uniform(k2, (mdim, qdim), jnp.float32, -bound, bound)
    bq = jax.random.uniform(k3, (mdim,), jnp.float32, -bound, bound)
    bk = jax.random.uniform(k4, (mdim,), jnp.float32, -bound, bound)
    return {"wq_t": wq.T, "bq": bq.reshape(1, mdim),
            "wk_t": wk.T, "bk": bk.reshape(1, mdim)}


if __name__ == "__main__":
    key = jax.random.PRNGKey(0)
    kparam, kq, kk, kv, km = jax.random.split(key, 5)

    def check(n, qdim, mdim, *, use_mask, block, score_dtype, atol, rtol,
              fully_masked_row=None):
        params = init_params(kparam, qdim, mdim)
        Q = jax.random.normal(kq, (n, qdim), jnp.float32)
        K = jax.random.normal(kk, (n, qdim), jnp.float32)
        V = jax.random.normal(kv, (n, qdim), jnp.float32)  # unused by forward
        mask = None
        if use_mask:
            mask = (jax.random.uniform(km, (n, n)) < 0.2).astype(jnp.float32)
            if fully_masked_row is not None:
                mask = mask.at[fully_masked_row, :].set(1.0)
        out = jax.block_until_ready(
            attention_agger(params, Q, K, V, mask=mask, block=block,
                            score_dtype=score_dtype))
        ref = attention_agger_ref(params, Q, K, V, mask=mask)
        assert out.shape == (n,), out.shape
        assert jnp.allclose(out, ref, rtol=rtol, atol=atol), (
            n, use_mask, str(score_dtype), float(jnp.max(jnp.abs(out - ref))))

    # Small graph (the module's natural demo shape), single tile.
    check(16, 32, 32, use_mask=False, block=256, score_dtype=jnp.float32,
          atol=1e-5, rtol=1e-5)
    check(16, 32, 32, use_mask=True, block=256, score_dtype=jnp.float32,
          atol=1e-5, rtol=1e-5)
    # Multi-tile grid with padding + a fully-masked-row edge case.
    check(200, 32, 32, use_mask=False, block=128, score_dtype=jnp.float32,
          atol=1e-5, rtol=1e-5)
    check(200, 32, 32, use_mask=True, block=128, score_dtype=jnp.float32,
          atol=1e-5, rtol=1e-5, fully_masked_row=3)
    # bf16 MXU inputs for the score matmul (f32 accumulation), looser tolerance.
    check(200, 32, 32, use_mask=True, block=128, score_dtype=jnp.bfloat16,
          atol=3e-2, rtol=3e-2, fully_masked_row=3)

    print("KERNEL_OK")
</pallas_src>

<mosaic_0001>
module attributes {stable_mosaic.version = 11 : i64} {
  func.func @_proj_kernel(%arg0: i32, %arg1: memref<128x32xf32, #tpu.memory_space<vmem>>, %arg2: memref<128x32xf32, #tpu.memory_space<vmem>>, %arg3: memref<32x32xf32, #tpu.memory_space<vmem>>, %arg4: memref<1x32xf32, #tpu.memory_space<vmem>>, %arg5: memref<32x32xf32, #tpu.memory_space<vmem>>, %arg6: memref<1x32xf32, #tpu.memory_space<vmem>>, %arg7: memref<128x32xf32, #tpu.memory_space<vmem>>, %arg8: memref<128x32xf32, #tpu.memory_space<vmem>>) attributes {dimension_semantics = [#tpu.dimension_semantics<parallel>], iteration_bounds = array<i64: 1>, scalar_prefetch = 0 : i64, scratch_operands = 0 : i64, tpu.core_type = #tpu.core_type<tc>, window_params = [{transform_indices = @transform_0, window_bounds = array<i64: 128, 32>}, {transform_indices = @transform_1, window_bounds = array<i64: 128, 32>}, {pipeline_mode = #tpu.pipeline_mode<synchronous>, transform_indices = @transform_2, window_bounds = array<i64: 32, 32>}, {pipeline_mode = #tpu.pipeline_mode<synchronous>, transform_indices = @transform_3, window_bounds = array<i64: 1, 32>}, {pipeline_mode = #tpu.pipeline_mode<synchronous>, transform_indices = @transform_4, window_bounds = array<i64: 32, 32>}, {pipeline_mode = #tpu.pipeline_mode<synchronous>, transform_indices = @transform_5, window_bounds = array<i64: 1, 32>}, {transform_indices = @transform_6, window_bounds = array<i64: 128, 32>}, {transform_indices = @transform_7, window_bounds = array<i64: 128, 32>}]} {
    %c0 = arith.constant 0 : index
    %c0_0 = arith.constant 0 : index
    %0 = vector.load %arg1[%c0, %c0_0] : memref<128x32xf32, #tpu.memory_space<vmem>>, vector<128x32xf32>
    %c0_1 = arith.constant 0 : index
    %c0_2 = arith.constant 0 : index
    %1 = vector.load %arg3[%c0_1, %c0_2] : memref<32x32xf32, #tpu.memory_space<vmem>>, vector<32x32xf32>
    %cst = arith.constant dense<0.000000e+00> : vector<128x32xf32>
    %2 = tpu.matmul %0, %1, %cst {dimension_numbers = #tpu.dot_dimension_numbers<[1], [0], [0], [1], [0, 0, 1, 1], [], []>} : vector<128x32xf32>, vector<32x32xf32>, vector<128x32xf32> -> vector<128x32xf32>
    %c0_3 = arith.constant 0 : index
    %c0_4 = arith.constant 0 : index
    %3 = vector.load %arg4[%c0_3, %c0_4] : memref<1x32xf32, #tpu.memory_space<vmem>>, vector<1x32xf32>
    %4 = vector.broadcast %3 : vector<1x32xf32> to vector<128x32xf32>
    %5 = arith.addf %2, %4 : vector<128x32xf32>
    %c0_5 = arith.constant 0 : index
    %c0_6 = arith.constant 0 : index
    %6 = vector.load %arg2[%c0_5, %c0_6] : memref<128x32xf32, #tpu.memory_space<vmem>>, vector<128x32xf32>
    %c0_7 = arith.constant 0 : index
    %c0_8 = arith.constant 0 : index
    %7 = vector.load %arg5[%c0_7, %c0_8] : memref<32x32xf32, #tpu.memory_space<vmem>>, vector<32x32xf32>
    %cst_9 = arith.constant dense<0.000000e+00> : vector<128x32xf32>
    %8 = tpu.matmul %6, %7, %cst_9 {dimension_numbers = #tpu.dot_dimension_numbers<[1], [0], [0], [1], [0, 0, 1, 1], [], []>} : vector<128x32xf32>, vector<32x32xf32>, vector<128x32xf32> -> vector<128x32xf32>
    %c0_10 = arith.constant 0 : index
    %c0_11 = arith.constant 0 : index
    %9 = vector.load %arg6[%c0_10, %c0_11] : memref<1x32xf32, #tpu.memory_space<vmem>>, vector<1x32xf32>
    %10 = vector.broadcast %9 : vector<1x32xf32> to vector<128x32xf32>
    %11 = arith.addf %8, %10 : vector<128x32xf32>
    %c0_12 = arith.constant 0 : index
    %c0_13 = arith.constant 0 : index
    %12 = vector.load %arg7[%c0_12, %c0_13] : memref<128x32xf32, #tpu.memory_space<vmem>>, vector<128x32xf32>
    tpu.vector_store %arg7[%c0_12, %c0_13], %5 {strides = array<i32>} : memref<128x32xf32, #tpu.memory_space<vmem>>, vector<128x32xf32>,
    %c0_14 = arith.constant 0 : index
    %c0_15 = arith.constant 0 : index
    %13 = vector.load %arg8[%c0_14, %c0_15] : memref<128x32xf32, #tpu.memory_space<vmem>>, vector<128x32xf32>
    tpu.vector_store %arg8[%c0_14, %c0_15], %11 {strides = array<i32>} : memref<128x32xf32, #tpu.memory_space<vmem>>, vector<128x32xf32>,
    return
  }
  func.func @transform_0(%arg0: i32) -> (i32, i32) {
    %c0_i32 = arith.constant 0 : i32
    %c0_i32_0 = arith.constant 0 : i32
    return %arg0, %c0_i32 : i32, i32
  }
  func.func @transform_1(%arg0: i32) -> (i32, i32) {
    %c0_i32 = arith.constant 0 : i32
    %c0_i32_0 = arith.constant 0 : i32
    return %arg0, %c0_i32 : i32, i32
  }
  func.func @transform_2(%arg0: i32) -> (i32, i32) {
    %c0_i32 = arith.constant 0 : i32
    %c0_i32_0 = arith.constant 0 : i32
    %c0_i32_1 = arith.constant 0 : i32
    return %c0_i32, %c0_i32_0 : i32, i32
  }
  func.func @transform_3(%arg0: i32) -> (i32, i32) {
    %c0_i32 = arith.constant 0 : i32
    %c0_i32_0 = arith.constant 0 : i32
    %c0_i32_1 = arith.constant 0 : i32
    return %c0_i32, %c0_i32_0 : i32, i32
  }
  func.func @transform_4(%arg0: i32) -> (i32, i32) {
    %c0_i32 = arith.constant 0 : i32
    %c0_i32_0 = arith.constant 0 : i32
    %c0_i32_1 = arith.constant 0 : i32
    return %c0_i32, %c0_i32_0 : i32, i32
  }
  func.func @transform_5(%arg0: i32) -> (i32, i32) {
    %c0_i32 = arith.constant 0 : i32
    %c0_i32_0 = arith.constant 0 : i32
    %c0_i32_1 = arith.constant 0 : i32
    return %c0_i32, %c0_i32_0 : i32, i32
  }
  func.func @transform_6(%arg0: i32) -> (i32, i32) {
    %c0_i32 = arith.constant 0 : i32
    %c0_i32_0 = arith.constant 0 : i32
    return %arg0, %c0_i32 : i32, i32
  }
  func.func @transform_7(%arg0: i32) -> (i32, i32) {
    %c0_i32 = arith.constant 0 : i32
    %c0_i32_0 = arith.constant 0 : i32
    return %arg0, %c0_i32 : i32, i32
  }
}

</mosaic_0001>

<bundles_post_ra>
// kernel: tpu_custom_call.1
= control target key start
LH: loop header
LB: loop body
LE: loop exit
PB: predicated region body
PF: predicated region fallthrough
CT: control target
= control target key end

     0   :  { %vm52_vm0 = vcmask 261120   ;;  %s1022_s2 = inlined_call_operand.vmem [shape: f32[32,32], index: 2, kind: input, shape index: {}]   ;;  %s1023_s4 = inlined_call_operand.vmem [shape: f32[32,32], index: 4, kind: input, shape index: {}]   ;;  %s1024_s0 = inlined_call_operand.vmem [shape: f32[128,32], index: 0, kind: input, shape index: {}]   ;;  %s1025_s1 = inlined_call_operand.vmem [shape: f32[128,32], index: 1, kind: input, shape index: {}]   ;;  %s1026_s3 = inlined_call_operand.vmem [shape: f32[1,32], index: 3, kind: input, shape index: {}]   ;;  %s1027_s5 = inlined_call_operand.vmem [shape: f32[1,32], index: 5, kind: input, shape index: {}]   ;;  %s1028_s6 = inlined_call_operand.vmem [shape: f32[128,32], index: 6, kind: output, shape index: {0}]   ;;  %s1029_s7 = inlined_call_operand.vmem [shape: f32[128,32], index: 7, kind: output, shape index: {1}]  }
   0x1   :  { %v41_v0 = vld [vmem:[%s1022_s2] sm:$0xff]  ;;  %v42_v1 = vld [vmem:[%s1022_s2 + $0x8] sm:$0xff]  ;;  %v43_v5 = vld [vmem:[%s1022_s2 + $0x10] sm:$0xff] }
   0x2   :  { %v262_v2 = vld [vmem:[%s1023_s4] sm:$0xff]  ;;  %v644_v3 = vpack.c.bf16 %v42_v1, %v41_v0  ;;  %v263_v4 = vld [vmem:[%s1023_s4 + $0x8] sm:$0xff]  ;;  %v44_v6 = vld [vmem:[%s1022_s2 + $0x18] sm:$0xff] }
   0x3   :  { %v652_v7 = vpack.c.bf16 %v263_v4, %v262_v2  ;;  %v648_v8 = vpack.c.bf16 %v44_v6, %v43_v5  ;;  %v264_v9 = vld [vmem:[%s1023_s4 + $0x10] sm:$0xff]  ;;  %v265_v10 = vld [vmem:[%s1023_s4 + $0x18] sm:$0xff]  ;;  %v25_v11 = vld [vmem:[%s1024_s0] sm:$0xff] }
   0x4   :  { %645 = vmatprep.subr.bf16.mxu0 %v644_v3  ;;  %v656_v12 = vpack.c.bf16 %v265_v10, %v264_v9  ;;  %588 = vmatprep.mubr.msk.f32.mxu0 %vm52_vm0, %v25_v11  ;;  %v246_v13 = vld [vmem:[%s1025_s1] sm:$0xff]  ;;  %v26_v14 = vld [vmem:[%s1024_s0 + $0x8] sm:$0xff]  ;;  %v27_v16 = vld [vmem:[%s1024_s0 + $0x10] sm:$0xff] }
   0x5   :  { %653 = vmatprep.subr.bf16.mxu1 %v652_v7  ;;  %647 = vmatpush3.bf16.msra.mxu0 %v644_v3  ;;  %v247_v15 = vld [vmem:[%s1025_s1 + $0x8] sm:$0xff]  ;;  %v248_v17 = vld [vmem:[%s1025_s1 + $0x10] sm:$0xff]  ;;  %v28_v18 = vld [vmem:[%s1024_s0 + $0x18] sm:$0xff] }
   0x6   :  { %655 = vmatpush3.bf16.msra.mxu1 %v652_v7  ;;  %649 = vmatprep.subr.bf16.mxu0 %v648_v8  ;;  %v249_v19 = vld [vmem:[%s1025_s1 + $0x18] sm:$0xff]  ;;  %v29_v20 = vld [vmem:[%s1024_s0 + $0x20] sm:$0xff]  ;;  %v30_v22 = vld [vmem:[%s1024_s0 + $0x28] sm:$0xff] }
   0x7   :  { %657 = vmatprep.subr.bf16.mxu1 %v656_v12  ;;  %620 = vmatprep.mubr.msk.f32.mxu1 %vm52_vm0, %v246_v13  ;;  %v250_v21 = vld [vmem:[%s1025_s1 + $0x20] sm:$0xff]  ;;  %v251_v23 = vld [vmem:[%s1025_s1 + $0x28] sm:$0xff]  ;;  %v31_v24 = vld [vmem:[%s1024_s0 + $0x30] sm:$0xff] }
   0x8   :  { %v252_v25 = vld [vmem:[%s1025_s1 + $0x30] sm:$0xff]  ;;  %v32_v26 = vld [vmem:[%s1024_s0 + $0x38] sm:$0xff]  ;;  %v33_v28 = vld [vmem:[%s1024_s0 + $0x40] sm:$0xff] }
   0x9   :  { %651 = vmatpush3.bf16.msra.mxu0 %v648_v8  ;;  %v253_v27 = vld [vmem:[%s1025_s1 + $0x38] sm:$0xff]  ;;  %v254_v29 = vld [vmem:[%s1025_s1 + $0x40] sm:$0xff]  ;;  %v34_v30 = vld [vmem:[%s1024_s0 + $0x48] sm:$0xff] }
   0xa   :  { %659 = vmatpush3.bf16.msra.mxu1 %v656_v12  ;;  %v255_v31 = vld [vmem:[%s1025_s1 + $0x48] sm:$0xff]  ;;  %v35_v32 = vld [vmem:[%s1024_s0 + $0x50] sm:$0xff]  ;;  %v36_v34 = vld [vmem:[%s1024_s0 + $0x58] sm:$0xff] }
   0xb   :  { %v256_v33 = vld [vmem:[%s1025_s1 + $0x50] sm:$0xff]  ;;  %v257_v35 = vld [vmem:[%s1025_s1 + $0x58] sm:$0xff]  ;;  %v37_v36 = vld [vmem:[%s1024_s0 + $0x60] sm:$0xff] }
   0xc   :  { %589 = vmatmul.mubr.msk.f32.vlgmr.msra.gmra.mrb[0].mxu0 %vm52_vm0, %v26_v14  ;;  %v258_v37 = vld [vmem:[%s1025_s1 + $0x60] sm:$0xff]  ;;  %v38_v38 = vld [vmem:[%s1024_s0 + $0x68] sm:$0xff]  ;;  %v39_v40 = vld [vmem:[%s1024_s0 + $0x70] sm:$0xff] }
   0xd   :  { %621 = vmatmul.mubr.msk.f32.vlgmr.msra.gmra.mrb[0].mxu1 %vm52_vm0, %v247_v15  ;;  %591 = vmatprep.mubr.msk.f32.mxu0 %vm52_vm0, %v27_v16  ;;  %v259_v39 = vld [vmem:[%s1025_s1 + $0x68] sm:$0xff]  ;;  %v260_v41 = vld [vmem:[%s1025_s1 + $0x70] sm:$0xff]  ;;  %v40_v42 = vld [vmem:[%s1024_s0 + $0x78] sm:$0xff] }
   0xe   :  { %623 = vmatprep.mubr.msk.f32.mxu1 %vm52_vm0, %v248_v17  ;;  %v261_v43 = vld [vmem:[%s1025_s1 + $0x78] sm:$0xff]  ;;  %v855_v44 = vld [vmem:[%s1026_s3] ss:$0 sm:$0xff] }
   0xf   :  { %v860_v45 = vld [vmem:[%s1027_s5] ss:$0 sm:$0xff] }
  0x10   :  { %592 = vmatmul.mubr.msk.f32.gmra.mrb[2].mxu0 %vm52_vm0, %v28_v18 }
  0x11   :  { %624 = vmatmul.mubr.msk.f32.gmra.mrb[2].mxu1 %vm52_vm0, %v249_v19  ;;  %594 = vmatprep.mubr.msk.f32.mxu0 %vm52_vm0, %v29_v20 }
  0x12   :  { %626 = vmatprep.mubr.msk.f32.mxu1 %vm52_vm0, %v250_v21 }
  0x14   :  { %595 = vmatmul.mubr.msk.f32.gmra.mrb[4].mxu0 %vm52_vm0, %v30_v22 }
  0x15   :  { %627 = vmatmul.mubr.msk.f32.gmra.mrb[4].mxu1 %vm52_vm0, %v251_v23  ;;  %597 = vmatprep.mubr.msk.f32.mxu0 %vm52_vm0, %v31_v24 }
  0x16   :  { %629 = vmatprep.mubr.msk.f32.mxu1 %vm52_vm0, %v252_v25 }
  0x18   :  { %598 = vmatmul.mubr.msk.f32.gmra.mrb[6].mxu0 %vm52_vm0, %v32_v26 }
  0x19   :  { %630 = vmatmul.mubr.msk.f32.gmra.mrb[6].mxu1 %vm52_vm0, %v253_v27  ;;  %600 = vmatprep.mubr.msk.f32.mxu0 %vm52_vm0, %v33_v28 }
  0x1a   :  { %632 = vmatprep.mubr.msk.f32.mxu1 %vm52_vm0, %v254_v29 }
  0x1c   :  { %601 = vmatmul.mubr.msk.f32.gmra.mrb[8].mxu0 %vm52_vm0, %v34_v30 }
  0x1d   :  { %633 = vmatmul.mubr.msk.f32.gmra.mrb[8].mxu1 %vm52_vm0, %v255_v31  ;;  %603 = vmatprep.mubr.msk.f32.mxu0 %vm52_vm0, %v35_v32 }
  0x1e   :  { %635 = vmatprep.mubr.msk.f32.mxu1 %vm52_vm0, %v256_v33 }
  0x20   :  { %604 = vmatmul.mubr.msk.f32.gmra.mrb[10].mxu0 %vm52_vm0, %v36_v34 }
  0x21   :  { %636 = vmatmul.mubr.msk.f32.gmra.mrb[10].mxu1 %vm52_vm0, %v257_v35  ;;  %606 = vmatprep.mubr.msk.f32.mxu0 %vm52_vm0, %v37_v36 }
  0x22   :  { %638 = vmatprep.mubr.msk.f32.mxu1 %vm52_vm0, %v258_v37 }
  0x24   :  { %607 = vmatmul.mubr.msk.f32.gmra.mrb[12].mxu0 %vm52_vm0, %v38_v38 }
  0x25   :  { %639 = vmatmul.mubr.msk.f32.gmra.mrb[12].mxu1 %vm52_vm0, %v259_v39  ;;  %609 = vmatprep.mubr.msk.f32.mxu0 %vm52_vm0, %v39_v40 }
  0x26   :  { %641 = vmatprep.mubr.msk.f32.mxu1 %vm52_vm0, %v260_v41 }
  0x28   :  { %610 = vmatmul.mubr.msk.f32.gmra.mrb[14].mxu0 %vm52_vm0, %v40_v42 }
  0x29   :  { %642 = vmatmul.mubr.msk.f32.gmra.mrb[14].mxu1 %vm52_vm0, %v261_v43 }
  0xdf   :  { %v590_v46 = vpop.f32.mrb[0].mxu0 }
  0xe0   :  { %v173_v47 = vadd.f32 %v590_v46, %v855_v44  ;;  %v622_v48 = vpop.f32.mrb[0].mxu1  ;;  %v167_v49 = vpop.f32.mrb[1].mxu0 }
  0xe1   :  { %v393_v50 = vadd.f32 %v622_v48, %v860_v45  ;;  %v168_v51 = vadd.f32 %v855_v44, %v167_v49  ;;  %v387_v52 = vpop.f32.mrb[1].mxu1 }
  0xe2   :  { %467 = vst.msk [vmem:[%s1028_s6 + $0x8] sm:$0xff] %vm52_vm0, %v173_v47  ;;  %v388_v53 = vadd.f32 %v860_v45, %v387_v52 }
  0xe3   :  { %483 = vst.msk [vmem:[%s1029_s7 + $0x8] sm:$0xff] %vm52_vm0, %v393_v50  ;;  %466 = vst.msk [vmem:[%s1028_s6] sm:$0xff] %vm52_vm0, %v168_v51  ;;  %v593_v54 = vpop.f32.mrb[2].mxu0 }
  0xe4   :  { %482 = vst.msk [vmem:[%s1029_s7] sm:$0xff] %vm52_vm0, %v388_v53  ;;  %v183_v55 = vadd.f32 %v593_v54, %v855_v44  ;;  %v625_v56 = vpop.f32.mrb[2].mxu1  ;;  %v177_v57 = vpop.f32.mrb[3].mxu0 }
  0xe5   :  { %v403_v58 = vadd.f32 %v625_v56, %v860_v45  ;;  %v178_v59 = vadd.f32 %v855_v44, %v177_v57  ;;  %v397_v60 = vpop.f32.mrb[3].mxu1 }
  0xe6   :  { %469 = vst.msk [vmem:[%s1028_s6 + $0x18] sm:$0xff] %vm52_vm0, %v183_v55  ;;  %v398_v61 = vadd.f32 %v860_v45, %v397_v60 }
  0xe7   :  { %485 = vst.msk [vmem:[%s1029_s7 + $0x18] sm:$0xff] %vm52_vm0, %v403_v58  ;;  %468 = vst.msk [vmem:[%s1028_s6 + $0x10] sm:$0xff] %vm52_vm0, %v178_v59  ;;  %v596_v62 = vpop.f32.mrb[4].mxu0 }
  0xe8   :  { %484 = vst.msk [vmem:[%s1029_s7 + $0x10] sm:$0xff] %vm52_vm0, %v398_v61  ;;  %v193_v63 = vadd.f32 %v596_v62, %v855_v44  ;;  %v628_v0 = vpop.f32.mrb[4].mxu1  ;;  %v187_v1 = vpop.f32.mrb[5].mxu0 }
  0xe9   :  { %v413_v2 = vadd.f32 %v628_v0, %v860_v45  ;;  %v188_v3 = vadd.f32 %v855_v44, %v187_v1  ;;  %v407_v4 = vpop.f32.mrb[5].mxu1 }
  0xea   :  { %471 = vst.msk [vmem:[%s1028_s6 + $0x28] sm:$0xff] %vm52_vm0, %v193_v63  ;;  %v408_v5 = vadd.f32 %v860_v45, %v407_v4 }
  0xeb   :  { %487 = vst.msk [vmem:[%s1029_s7 + $0x28] sm:$0xff] %vm52_vm0, %v413_v2  ;;  %470 = vst.msk [vmem:[%s1028_s6 + $0x20] sm:$0xff] %vm52_vm0, %v188_v3  ;;  %v599_v6 = vpop.f32.mrb[6].mxu0 }
  0xec   :  { %486 = vst.msk [vmem:[%s1029_s7 + $0x20] sm:$0xff] %vm52_vm0, %v408_v5  ;;  %v203_v7 = vadd.f32 %v599_v6, %v855_v44  ;;  %v631_v8 = vpop.f32.mrb[6].mxu1  ;;  %v197_v9 = vpop.f32.mrb[7].mxu0 }
  0xed   :  { %v423_v10 = vadd.f32 %v631_v8, %v860_v45  ;;  %v198_v11 = vadd.f32 %v855_v44, %v197_v9  ;;  %v417_v12 = vpop.f32.mrb[7].mxu1 }
  0xee   :  { %473 = vst.msk [vmem:[%s1028_s6 + $0x38] sm:$0xff] %vm52_vm0, %v203_v7  ;;  %v418_v13 = vadd.f32 %v860_v45, %v417_v12 }
  0xef   :  { %489 = vst.msk [vmem:[%s1029_s7 + $0x38] sm:$0xff] %vm52_vm0, %v423_v10  ;;  %472 = vst.msk [vmem:[%s1028_s6 + $0x30] sm:$0xff] %vm52_vm0, %v198_v11  ;;  %v602_v14 = vpop.f32.mrb[8].mxu0 }
  0xf0   :  { %488 = vst.msk [vmem:[%s1029_s7 + $0x30] sm:$0xff] %vm52_vm0, %v418_v13  ;;  %v213_v15 = vadd.f32 %v602_v14, %v855_v44  ;;  %v634_v16 = vpop.f32.mrb[8].mxu1  ;;  %v207_v17 = vpop.f32.mrb[9].mxu0 }
  0xf1   :  { %v433_v18 = vadd.f32 %v634_v16, %v860_v45  ;;  %v208_v19 = vadd.f32 %v855_v44, %v207_v17  ;;  %v427_v20 = vpop.f32.mrb[9].mxu1 }
  0xf2   :  { %475 = vst.msk [vmem:[%s1028_s6 + $0x48] sm:$0xff] %vm52_vm0, %v213_v15  ;;  %v428_v21 = vadd.f32 %v860_v45, %v427_v20 }
  0xf3   :  { %491 = vst.msk [vmem:[%s1029_s7 + $0x48] sm:$0xff] %vm52_vm0, %v433_v18  ;;  %474 = vst.msk [vmem:[%s1028_s6 + $0x40] sm:$0xff] %vm52_vm0, %v208_v19  ;;  %v605_v22 = vpop.f32.mrb[10].mxu0 }
  0xf4   :  { %490 = vst.msk [vmem:[%s1029_s7 + $0x40] sm:$0xff] %vm52_vm0, %v428_v21  ;;  %v223_v23 = vadd.f32 %v605_v22, %v855_v44  ;;  %v637_v24 = vpop.f32.mrb[10].mxu1  ;;  %v217_v25 = vpop.f32.mrb[11].mxu0 }
  0xf5   :  { %v443_v26 = vadd.f32 %v637_v24, %v860_v45  ;;  %v218_v27 = vadd.f32 %v855_v44, %v217_v25  ;;  %v437_v28 = vpop.f32.mrb[11].mxu1 }
  0xf6   :  { %477 = vst.msk [vmem:[%s1028_s6 + $0x58] sm:$0xff] %vm52_vm0, %v223_v23  ;;  %v438_v29 = vadd.f32 %v860_v45, %v437_v28 }
  0xf7   :  { %493 = vst.msk [vmem:[%s1029_s7 + $0x58] sm:$0xff] %vm52_vm0, %v443_v26  ;;  %476 = vst.msk [vmem:[%s1028_s6 + $0x50] sm:$0xff] %vm52_vm0, %v218_v27  ;;  %v608_v30 = vpop.f32.mrb[12].mxu0 }
  0xf8   :  { %492 = vst.msk [vmem:[%s1029_s7 + $0x50] sm:$0xff] %vm52_vm0, %v438_v29  ;;  %v233_v31 = vadd.f32 %v608_v30, %v855_v44  ;;  %v640_v32 = vpop.f32.mrb[12].mxu1  ;;  %v227_v33 = vpop.f32.mrb[13].mxu0 }
  0xf9   :  { %v453_v34 = vadd.f32 %v640_v32, %v860_v45  ;;  %v228_v35 = vadd.f32 %v855_v44, %v227_v33  ;;  %v447_v36 = vpop.f32.mrb[13].mxu1 }
  0xfa   :  { %479 = vst.msk [vmem:[%s1028_s6 + $0x68] sm:$0xff] %vm52_vm0, %v233_v31  ;;  %v448_v37 = vadd.f32 %v860_v45, %v447_v36 }
  0xfb   :  { %495 = vst.msk [vmem:[%s1029_s7 + $0x68] sm:$0xff] %vm52_vm0, %v453_v34  ;;  %478 = vst.msk [vmem:[%s1028_s6 + $0x60] sm:$0xff] %vm52_vm0, %v228_v35  ;;  %v611_v38 = vpop.f32.mrb[14].mxu0 }
  0xfc   :  { %494 = vst.msk [vmem:[%s1029_s7 + $0x60] sm:$0xff] %vm52_vm0, %v448_v37  ;;  %v243_v39 = vadd.f32 %v611_v38, %v855_v44  ;;  %v643_v40 = vpop.f32.mrb[14].mxu1  ;;  %v237_v41 = vpop.f32.mrb[15].mxu0 }
  0xfd   :  { %v463_v42 = vadd.f32 %v643_v40, %v860_v45  ;;  %v238_v43 = vadd.f32 %v855_v44, %v237_v41  ;;  %v457_v46 = vpop.f32.mrb[15].mxu1 }
  0xfe   :  { %481 = vst.msk [vmem:[%s1028_s6 + $0x78] sm:$0xff] %vm52_vm0, %v243_v39  ;;  %v458_v47 = vadd.f32 %v860_v45, %v457_v46 }
  0xff   :  { %497 = vst.msk [vmem:[%s1029_s7 + $0x78] sm:$0xff] %vm52_vm0, %v463_v42  ;;  %480 = vst.msk [vmem:[%s1028_s6 + $0x70] sm:$0xff] %vm52_vm0, %v238_v43 }
 0x100   :  { %496 = vst.msk [vmem:[%s1029_s7 + $0x70] sm:$0xff] %vm52_vm0, %v458_v47 }

</bundles_post_ra>
